<compile_context>
chip_gen: v7x
topology: tpu7x:2x2x1
jax: 0.10.0
libtpu: 0.0.40
codegen_flags: <defaults>
</compile_context>

<pallas_src>
import functools

import jax
import jax.numpy as jnp
from jax import lax
from jax.experimental import pallas as pl
from jax.experimental.pallas import tpu as pltpu


def _make_kernel(*, max_violation, has_pad, bm, bn):
    def kernel(im_ref, s_ref, dcol_ref, drow_ref, *rest):
        pos = 0
        if has_pad:
            pcol_ref, prow_ref = rest[0], rest[1]
            pos = 2
        if max_violation:
            row_out_ref, col_out_ref = rest[pos], rest[pos + 1]
        else:
            row_out_ref = rest[pos]
            col_out_ref = None

        i = pl.program_id(0)   # row tile (parallel across TCs)
        j = pl.program_id(1)   # col tile (reduction axis for row_out)

        @pl.when(j == 0)
        def _init():
            row_out_ref[...] = jnp.zeros_like(row_out_ref)

        # (bm, bn) scores tile on the MXU; operands stay in their (bf16) input
        # dtype, accumulate in f32; contraction on the feature axis avoids
        # materializing s.T.
        scores = lax.dot_general(
            im_ref[...], s_ref[...],
            dimension_numbers=(((1,), (1,)), ((), ())),
            preferred_element_type=jnp.float32)

        col0 = pl.multiple_of(j * bn, bn)
        if has_pad:
            # Padded rows / cols get -BIG so the relu'd costs are exactly 0.
            scores = scores - pcol_ref[...] - prow_ref[:, pl.ds(col0, bn)]

        d1 = dcol_ref[...]                     # (bm, 1)  diag - margin (rows)
        d2 = drow_ref[:, pl.ds(col0, bn)]      # (1, bn)  diag - margin (cols)

        cost_s = jnp.maximum(scores - d1, 0.0)   # relu(margin + scores - diag_r)
        cost_im = jnp.maximum(scores - d2, 0.0)  # relu(margin + scores - diag_c)

        def _accumulate(c_s, c_im):
            if max_violation:
                row_out_ref[...] = jnp.maximum(
                    row_out_ref[...], jnp.max(c_s, axis=1, keepdims=True))
                col_out_ref[...] = jnp.max(
                    c_im, axis=0, keepdims=True).reshape(col_out_ref.shape)
            else:
                row_out_ref[...] += jnp.sum(c_s + c_im, axis=1, keepdims=True)

        # Only diagonal-straddling tiles pay for the iota/compare/select mask.
        straddle = (i * bm < (j + 1) * bn) & (j * bn < (i + 1) * bm)

        @pl.when(straddle)
        def _masked():
            rows = i * bm + lax.broadcasted_iota(jnp.int32, (bm, bn), 0)
            cols = j * bn + lax.broadcasted_iota(jnp.int32, (bm, bn), 1)
            off_diag = rows != cols
            _accumulate(jnp.where(off_diag, cost_s, 0.0),
                        jnp.where(off_diag, cost_im, 0.0))

        @pl.when(jnp.logical_not(straddle))
        def _fast():
            _accumulate(cost_s, cost_im)

    return kernel


def _round_up(x, m):
    return -(-x // m) * m


def contrastive_loss(im, s, *, margin=0.0, max_violation=False,
                     block_m=None, block_n=None, compute_dtype=jnp.bfloat16):
    """Pallas equivalent of ContrastiveLoss(margin, 'cosine', max_violation).
    im, s: (N, D) arrays. Returns an f32 scalar."""
    assert im.ndim == 2 and im.shape == s.shape
    n, d = im.shape
    if compute_dtype is None:
        compute_dtype = im.dtype
    op_itemsize = jnp.dtype(compute_dtype).itemsize

    # --- tiling --------------------------------------------------------------
    n_pad = max(128, _round_up(n, 128))       # lane-align the batch axis
    bm = block_m if block_m is not None else next(
        c for c in (512, 256, 128) if n_pad % c == 0)
    bn = block_n if block_n is not None else (256 if n_pad % 256 == 0 else 128)
    # NOTE: on v5e, block_n=128 can be preferable (narrower f32 cost tiles).

    def _hot_bytes(bm_, bn_):
        # pipelined operand buffers + f32 score/cost temporaries
        return (2 * bm_ + 3 * bn_) * d * op_itemsize + 6 * bm_ * bn_ * 4

    if block_m is None:
        while bm > 128 and _hot_bytes(bm, bn) > 24 * 1024 * 1024:
            bm //= 2
    if block_n is None:
        while bn > 128 and _hot_bytes(bm, bn) > 24 * 1024 * 1024:
            bn //= 2

    assert n_pad % bm == 0 and n_pad % bn == 0, (n_pad, bm, bn)
    assert bm % 8 == 0 and bn % 128 == 0, (bm, bn)
    ni, nj = n_pad // bm, n_pad // bn
    has_pad = n_pad != n

    # --- operands ------------------------------------------------------------
    if has_pad:
        im = jnp.pad(im, ((0, n_pad - n), (0, 0)))
        s = jnp.pad(s, ((0, n_pad - n), (0, 0)))
    im_c = im.astype(compute_dtype)
    s_c = s.astype(compute_dtype)

    # diag(im @ s.T) as an O(N*D) elementwise reduce; margin folded in so the
    # kernel does relu(scores - dvec) with no per-tile margin add.
    diag = jnp.sum(im_c.astype(jnp.float32) * s_c.astype(jnp.float32), axis=-1)
    diag = diag - jnp.float32(margin)

    inputs = [im_c, s_c, diag.reshape(n_pad, 1), diag.reshape(1, n_pad)]
    if nj >= 3:
        s_spec = pl.BlockSpec((bn, d), lambda i, j: (j, 0),
                              pipeline_mode=pl.Buffered(3))
    else:
        s_spec = pl.BlockSpec((bn, d), lambda i, j: (j, 0))
    in_specs = [
        pl.BlockSpec((bm, d), lambda i, j: (i, 0)),     # im rows (per i only)
        s_spec,                                         # s rows (per step)
        pl.BlockSpec((bm, 1), lambda i, j: (i, 0)),     # diag, column layout
        pl.BlockSpec((1, n_pad), lambda i, j: (0, 0)),  # diag, row layout (resident)
    ]
    if has_pad:
        pad_pen = jnp.where(jnp.arange(n_pad) >= n,
                            jnp.float32(1e30), jnp.float32(0.0))
        inputs += [pad_pen.reshape(n_pad, 1), pad_pen.reshape(1, n_pad)]
        in_specs += [
            pl.BlockSpec((bm, 1), lambda i, j: (i, 0)),
            pl.BlockSpec((1, n_pad), lambda i, j: (0, 0)),
        ]

    row_shape = jax.ShapeDtypeStruct((n_pad, 1), jnp.float32)
    row_spec = pl.BlockSpec((bm, 1), lambda i, j: (i, 0))
    if max_violation:
        out_shape = (row_shape,
                     jax.ShapeDtypeStruct((ni, 1, n_pad), jnp.float32))
        out_specs = (row_spec,
                     pl.BlockSpec((1, 1, bn), lambda i, j: (i, 0, j)))
    else:
        out_shape = row_shape
        out_specs = row_spec

    # --- VMEM budget: computed from the footprint, <= ~75% of physical -------
    phys_vmem = 64 * 1024 * 1024              # v7x worst case fallback
    try:
        phys_vmem = int(pltpu.get_tpu_info().vmem_capacity_bytes)
    except Exception:
        pass
    est = (_hot_bytes(bm, bn)
           + 4 * (bm * 128 + 8 * n_pad) * 4       # diag / pad vector buffers
           + 4 * bm * 128 * 4 + 4 * 8 * bn * 4)   # output buffers
    vmem_limit = int(min(max(2 * est, 32 * 1024 * 1024),
                         min((phys_vmem * 3) // 4, 96 * 1024 * 1024)))

    cost = pl.CostEstimate(
        flops=2 * n_pad * n_pad * d,
        transcendentals=0,
        bytes_accessed=(n_pad * d * op_itemsize            # im streamed once
                        + ni * n_pad * d * op_itemsize     # s streamed ni times
                        + 8 * n_pad
                        + 4 * n_pad * (1 + (ni if max_violation else 0))))

    kernel = _make_kernel(max_violation=bool(max_violation),
                          has_pad=has_pad, bm=bm, bn=bn)

    out = pl.pallas_call(
        kernel,
        out_shape=out_shape,
        grid_spec=pltpu.PrefetchScalarGridSpec(
            num_scalar_prefetch=0,
            grid=(ni, nj),
            in_specs=in_specs,
            out_specs=out_specs,
        ),
        compiler_params=pltpu.CompilerParams(
            # Row tiles are fully independent -> the i axis can be split across
            # v7x's two TensorCores; j is the in-row reduction axis.
            dimension_semantics=("parallel", "arbitrary"),
            vmem_limit_bytes=vmem_limit),
        cost_estimate=cost,
    )(*inputs)

    if max_violation:
        row_out, col_out = out
        # row_out: per-row max of cost_s. col_out: per-(row-tile, col) max of
        # cost_im -> finish the cross-row-tile max and the sums here (O(N)).
        return jnp.sum(row_out) + jnp.sum(jnp.max(col_out, axis=0))
    return jnp.sum(out)


def _reference_loss(im, s, margin=0.0, max_violation=False):
    """Pure-JAX reference matching the PyTorch forward (cosine measure)."""
    scores = jnp.matmul(im.astype(jnp.float32), s.astype(jnp.float32).T,
                        precision=lax.Precision.HIGHEST)
    diag = jnp.diag(scores).reshape(-1, 1)
    cost_s = jnp.maximum(margin + scores - diag, 0.0)
    cost_im = jnp.maximum(margin + scores - diag.T, 0.0)
    eye = jnp.eye(scores.shape[0], dtype=bool)
    cost_s = jnp.where(eye, 0.0, cost_s)
    cost_im = jnp.where(eye, 0.0, cost_im)
    if max_violation:
        cost_s = cost_s.max(axis=1)
        cost_im = cost_im.max(axis=0)
    return cost_s.sum() + cost_im.sum()


if __name__ == "__main__":
    key = jax.random.PRNGKey(0)

    def check(n, d, margin, max_violation, tol, **kw):
        k_im, k_s = jax.random.split(jax.random.fold_in(key, n * 1000 + d))
        im = jax.random.normal(k_im, (n, d), jnp.float32)
        s = jax.random.normal(k_s, (n, d), jnp.float32)
        fn = jax.jit(functools.partial(contrastive_loss, margin=margin,
                                       max_violation=max_violation, **kw))
        out = fn(im, s)
        jax.block_until_ready(out)
        cd = kw.get("compute_dtype", jnp.bfloat16)
        ref = _reference_loss(im.astype(cd).astype(jnp.float32),
                              s.astype(cd).astype(jnp.float32),
                              margin, max_violation)
        assert jnp.allclose(out, ref, rtol=tol, atol=10 * tol), (
            n, d, margin, max_violation, float(out), float(ref))

    # Single padded tile (N=8 padded to 128), both loss modes, bf16 operands.
    check(8, 32, 0.0, False, 5e-3)
    check(8, 32, 0.2, True, 5e-3)
    # f32 operand path, tight tolerance against the f32 reference.
    check(8, 32, 0.2, True, 1e-4, compute_dtype=jnp.float32)
    # Multi-tile (2, 2) grid, aligned N: exercises the parallel row axis,
    # per-row-tile outputs and the diagonal-straddle fast path.
    check(256, 32, 0.0, False, 5e-3, block_m=128, block_n=128)
    check(256, 32, 0.2, True, 5e-3, block_m=128, block_n=128)
    # Non-divisible N (200 -> padded to 256) on a (2, 2) grid.
    check(200, 64, 0.0, False, 5e-3, block_m=128, block_n=128)
    check(200, 64, 0.2, True, 5e-3, block_m=128, block_n=128)
    # nj >= 3 exercises the Buffered(3) pipeline mode on the s spec.
    check(384, 32, 0.2, True, 5e-3, block_n=128)

    print("KERNEL_OK")
</pallas_src>

<mosaic_0001>
module attributes {stable_mosaic.version = 11 : i64} {
  func.func @kernel(%arg0: i32, %arg1: i32, %arg2: memref<128x32xbf16, #tpu.memory_space<vmem>>, %arg3: memref<128x32xbf16, #tpu.memory_space<vmem>>, %arg4: memref<128x1xf32, #tpu.memory_space<vmem>>, %arg5: memref<1x128xf32, #tpu.memory_space<vmem>>, %arg6: memref<128x1xf32, #tpu.memory_space<vmem>>, %arg7: memref<1x128xf32, #tpu.memory_space<vmem>>, %arg8: memref<128x1xf32, #tpu.memory_space<vmem>>) attributes {dimension_semantics = [#tpu.dimension_semantics<parallel>, #tpu.dimension_semantics<arbitrary>], iteration_bounds = array<i64: 1, 1>, scalar_prefetch = 0 : i64, scratch_operands = 0 : i64, tpu.core_type = #tpu.core_type<tc>, window_params = [{transform_indices = @transform_0, window_bounds = array<i64: 128, 32>}, {transform_indices = @transform_1, window_bounds = array<i64: 128, 32>}, {transform_indices = @transform_2, window_bounds = array<i64: 128, 1>}, {pipeline_mode = #tpu.pipeline_mode<synchronous>, transform_indices = @transform_3, window_bounds = array<i64: 1, 128>}, {transform_indices = @transform_4, window_bounds = array<i64: 128, 1>}, {pipeline_mode = #tpu.pipeline_mode<synchronous>, transform_indices = @transform_5, window_bounds = array<i64: 1, 128>}, {transform_indices = @transform_6, window_bounds = array<i64: 128, 1>}]} {
    %c0_i32 = arith.constant 0 : i32
    %0 = arith.cmpi eq, %arg1, %c0_i32 : i32
    %1 = arith.extui %0 : i1 to i32
    %c0_i32_0 = arith.constant 0 : i32
    %2 = arith.cmpi ne, %1, %c0_i32_0 : i32
    scf.if %2 {
      %cst_19 = arith.constant 0.000000e+00 : f32
      %40 = vector.broadcast %cst_19 : f32 to vector<128x1xf32>
      %c0_20 = arith.constant 0 : index
      %c0_21 = arith.constant 0 : index
      %41 = vector.load %arg8[%c0_20, %c0_21] : memref<128x1xf32, #tpu.memory_space<vmem>>, vector<128x1xf32>
      tpu.vector_store %arg8[%c0_20, %c0_21], %40 {strides = array<i32>} : memref<128x1xf32, #tpu.memory_space<vmem>>, vector<128x1xf32>,
    } else {
    }
    %c0 = arith.constant 0 : index
    %c0_1 = arith.constant 0 : index
    %3 = vector.load %arg2[%c0, %c0_1] : memref<128x32xbf16, #tpu.memory_space<vmem>>, vector<128x32xbf16>
    %c0_2 = arith.constant 0 : index
    %c0_3 = arith.constant 0 : index
    %4 = vector.load %arg3[%c0_2, %c0_3] : memref<128x32xbf16, #tpu.memory_space<vmem>>, vector<128x32xbf16>
    %cst = arith.constant dense<0.000000e+00> : vector<128x128xf32>
    %5 = tpu.matmul %3, %4, %cst {dimension_numbers = #tpu.dot_dimension_numbers<[1], [1], [0], [0], [0, 0, 1, 0], [], []>} : vector<128x32xbf16>, vector<128x32xbf16>, vector<128x128xf32> -> vector<128x128xf32>
    %c128_i32 = arith.constant 128 : i32
    %6 = arith.muli %arg1, %c128_i32 : i32
    %7 = tpu.assume_multiple %6, 128 : i32
    %c0_4 = arith.constant 0 : index
    %c0_5 = arith.constant 0 : index
    %8 = vector.load %arg6[%c0_4, %c0_5] : memref<128x1xf32, #tpu.memory_space<vmem>>, vector<128x1xf32>
    %9 = vector.broadcast %8 : vector<128x1xf32> to vector<128x128xf32>
    %10 = arith.subf %5, %9 : vector<128x128xf32>
    %c0_6 = arith.constant 0 : index
    %11 = arith.index_cast %7 : i32 to index
    %12 = vector.load %arg7[%c0_6, %11] : memref<1x128xf32, #tpu.memory_space<vmem>>, vector<1x128xf32>
    %13 = vector.broadcast %12 : vector<1x128xf32> to vector<128x128xf32>
    %14 = arith.subf %10, %13 : vector<128x128xf32>
    %c0_7 = arith.constant 0 : index
    %c0_8 = arith.constant 0 : index
    %15 = vector.load %arg4[%c0_7, %c0_8] : memref<128x1xf32, #tpu.memory_space<vmem>>, vector<128x1xf32>
    %c0_9 = arith.constant 0 : index
    %16 = arith.index_cast %7 : i32 to index
    %17 = vector.load %arg5[%c0_9, %16] : memref<1x128xf32, #tpu.memory_space<vmem>>, vector<1x128xf32>
    %18 = vector.broadcast %15 : vector<128x1xf32> to vector<128x128xf32>
    %19 = arith.subf %14, %18 : vector<128x128xf32>
    %cst_10 = arith.constant 0.000000e+00 : f32
    %20 = vector.broadcast %cst_10 : f32 to vector<128x128xf32>
    %21 = arith.maximumf %19, %20 : vector<128x128xf32>
    %22 = vector.broadcast %17 : vector<1x128xf32> to vector<128x128xf32>
    %23 = arith.subf %14, %22 : vector<128x128xf32>
    %cst_11 = arith.constant 0.000000e+00 : f32
    %24 = vector.broadcast %cst_11 : f32 to vector<128x128xf32>
    %25 = arith.maximumf %23, %24 : vector<128x128xf32>
    %c128_i32_12 = arith.constant 128 : i32
    %26 = arith.muli %arg0, %c128_i32_12 : i32
    %c1_i32 = arith.constant 1 : i32
    %27 = arith.addi %arg1, %c1_i32 : i32
    %c128_i32_13 = arith.constant 128 : i32
    %28 = arith.muli %27, %c128_i32_13 : i32
    %29 = arith.cmpi slt, %26, %28 : i32
    %c128_i32_14 = arith.constant 128 : i32
    %30 = arith.muli %arg1, %c128_i32_14 : i32
    %c1_i32_15 = arith.constant 1 : i32
    %31 = arith.addi %arg0, %c1_i32_15 : i32
    %c128_i32_16 = arith.constant 128 : i32
    %32 = arith.muli %31, %c128_i32_16 : i32
    %33 = arith.cmpi slt, %30, %32 : i32
    %34 = arith.andi %29, %33 : i1
    %35 = arith.extui %34 : i1 to i32
    %c0_i32_17 = arith.constant 0 : i32
    %36 = arith.cmpi ne, %35, %c0_i32_17 : i32
    scf.if %36 {
      %c128_i32_19 = arith.constant 128 : i32
      %40 = arith.muli %arg0, %c128_i32_19 : i32
      %41 = tpu.iota {dimensions = array<i32: 0>} : vector<128x128xi32>
      %42 = vector.broadcast %40 : i32 to vector<128x128xi32>
      %43 = arith.addi %42, %41 : vector<128x128xi32>
      %c128_i32_20 = arith.constant 128 : i32
      %44 = arith.muli %arg1, %c128_i32_20 : i32
      %45 = tpu.iota {dimensions = array<i32: 1>} : vector<128x128xi32>
      %46 = vector.broadcast %44 : i32 to vector<128x128xi32>
      %47 = arith.addi %46, %45 : vector<128x128xi32>
      %48 = arith.cmpi ne, %43, %47 : vector<128x128xi32>
      %cst_21 = arith.constant 0.000000e+00 : f32
      %49 = vector.broadcast %cst_21 : f32 to vector<128x128xf32>
      %50 = arith.select %48, %21, %49 : vector<128x128xi1>, vector<128x128xf32>
      %cst_22 = arith.constant 0.000000e+00 : f32
      %51 = vector.broadcast %cst_22 : f32 to vector<128x128xf32>
      %52 = arith.select %48, %25, %51 : vector<128x128xi1>, vector<128x128xf32>
      %c0_23 = arith.constant 0 : index
      %c0_24 = arith.constant 0 : index
      %53 = vector.load %arg8[%c0_23, %c0_24] : memref<128x1xf32, #tpu.memory_space<vmem>>, vector<128x1xf32>
      %54 = arith.addf %50, %52 : vector<128x128xf32>
      %cst_25 = arith.constant dense<0.000000e+00> : vector<128xf32>
      %55 = vector.multi_reduction <add>, %54, %cst_25 [1] : vector<128x128xf32> to vector<128xf32>
      %56 = vector.shape_cast %55 : vector<128xf32> to vector<128x1xf32>
      %57 = arith.addf %53, %56 : vector<128x1xf32>
      %c0_26 = arith.constant 0 : index
      %c0_27 = arith.constant 0 : index
      %58 = vector.load %arg8[%c0_26, %c0_27] : memref<128x1xf32, #tpu.memory_space<vmem>>, vector<128x1xf32>
      tpu.vector_store %arg8[%c0_26, %c0_27], %57 {strides = array<i32>} : memref<128x1xf32, #tpu.memory_space<vmem>>, vector<128x1xf32>,
    } else {
    }
    %true = arith.constant true
    %37 = arith.xori %34, %true : i1
    %38 = arith.extui %37 : i1 to i32
    %c0_i32_18 = arith.constant 0 : i32
    %39 = arith.cmpi ne, %38, %c0_i32_18 : i32
    scf.if %39 {
      %c0_19 = arith.constant 0 : index
      %c0_20 = arith.constant 0 : index
      %40 = vector.load %arg8[%c0_19, %c0_20] : memref<128x1xf32, #tpu.memory_space<vmem>>, vector<128x1xf32>
      %41 = arith.addf %21, %25 : vector<128x128xf32>
      %cst_21 = arith.constant dense<0.000000e+00> : vector<128xf32>
      %42 = vector.multi_reduction <add>, %41, %cst_21 [1] : vector<128x128xf32> to vector<128xf32>
      %43 = vector.shape_cast %42 : vector<128xf32> to vector<128x1xf32>
      %44 = arith.addf %40, %43 : vector<128x1xf32>
      %c0_22 = arith.constant 0 : index
      %c0_23 = arith.constant 0 : index
      %45 = vector.load %arg8[%c0_22, %c0_23] : memref<128x1xf32, #tpu.memory_space<vmem>>, vector<128x1xf32>
      tpu.vector_store %arg8[%c0_22, %c0_23], %44 {strides = array<i32>} : memref<128x1xf32, #tpu.memory_space<vmem>>, vector<128x1xf32>,
    } else {
    }
    return
  }
  func.func @transform_0(%arg0: i32, %arg1: i32) -> (i32, i32) {
    %c0_i32 = arith.constant 0 : i32
    %c0_i32_0 = arith.constant 0 : i32
    return %arg0, %c0_i32 : i32, i32
  }
  func.func @transform_1(%arg0: i32, %arg1: i32) -> (i32, i32) {
    %c0_i32 = arith.constant 0 : i32
    %c0_i32_0 = arith.constant 0 : i32
    return %arg1, %c0_i32 : i32, i32
  }
  func.func @transform_2(%arg0: i32, %arg1: i32) -> (i32, i32) {
    %c0_i32 = arith.constant 0 : i32
    %c0_i32_0 = arith.constant 0 : i32
    return %arg0, %c0_i32 : i32, i32
  }
  func.func @transform_3(%arg0: i32, %arg1: i32) -> (i32, i32) {
    %c0_i32 = arith.constant 0 : i32
    %c0_i32_0 = arith.constant 0 : i32
    %c0_i32_1 = arith.constant 0 : i32
    return %c0_i32, %c0_i32_0 : i32, i32
  }
  func.func @transform_4(%arg0: i32, %arg1: i32) -> (i32, i32) {
    %c0_i32 = arith.constant 0 : i32
    %c0_i32_0 = arith.constant 0 : i32
    return %arg0, %c0_i32 : i32, i32
  }
  func.func @transform_5(%arg0: i32, %arg1: i32) -> (i32, i32) {
    %c0_i32 = arith.constant 0 : i32
    %c0_i32_0 = arith.constant 0 : i32
    %c0_i32_1 = arith.constant 0 : i32
    return %c0_i32, %c0_i32_0 : i32, i32
  }
  func.func @transform_6(%arg0: i32, %arg1: i32) -> (i32, i32) {
    %c0_i32 = arith.constant 0 : i32
    %c0_i32_0 = arith.constant 0 : i32
    return %arg0, %c0_i32 : i32, i32
  }
}

</mosaic_0001>

<bundles_post_ra>
// kernel: contrastive_loss.1
= control target key start
LH: loop header
LB: loop body
LE: loop exit
PB: predicated region body
PF: predicated region fallthrough
CT: control target
= control target key end

     0   :  { %vm157_vm0 = vcmask 261120   ;;  %v1036_v1 = vmov 0   ;;  %vm28_vm1 = vcmask 7168   ;;  %v1037_v58 = vmov 0.0   ;;  %s1721_s1 = inlined_call_operand.vmem [shape: bf16[128,32], index: 1, kind: input, shape index: {}]   ;;  %s1722_s4 = inlined_call_operand.vmem [shape: f32[128,1], index: 4, kind: input, shape index: {}]   ;;  %s1723_s0 = inlined_call_operand.vmem [shape: bf16[128,32], index: 0, kind: input, shape index: {}]   ;;  %s1724_s2 = inlined_call_operand.vmem [shape: f32[128,1], index: 2, kind: input, shape index: {}]   ;;  %s1725_s6 = inlined_call_operand.vmem [shape: f32[128,1], index: 6, kind: output, shape index: {}]   ;;  %s1726_s5 = inlined_call_operand.vmem [shape: f32[1,128], index: 5, kind: input, shape index: {}]   ;;  %s1727_s3 = inlined_call_operand.vmem [shape: f32[1,128], index: 3, kind: input, shape index: {}]  }
   0x1   :  { %v1020_v0 = vld [vmem:[%s1721_s1] sm:$0xff]   ;;  %1018 = vset.pattern.permute.xlu0 %v1036_v1  ;;  %1019 = vset.pattern.permute.xlu1 %v1036_v1  ;;  %v1021_v2 = vld [vmem:[%s1721_s1 + $0x8] sm:$0xff]   ;;  %v306_v5 = vld [vmem:[%s1722_s4 + $0x10] sm:$0xff]  ;;  %39 = vst.msk [vmem:[%s1725_s6 + $0x50] sm:$0xff] %vm28_vm1, %v1037_v58 }
   0x2   :  { %1000 = vmatprep.subr.msk.bf16.mxu0 %vm157_vm0, %v1020_v0  ;;  %1001 = vmatprep.subr.msk.bf16.mxu1 %vm157_vm0, %v1020_v0  ;;  %v183_v3 = vsel %vm157_vm0, %v1020_v0, 0  ;;  %v304_v4 = vld [vmem:[%s1722_s4] sm:$0xff]  ;;  %v186_v6 = vsel %vm157_vm0, %v1021_v2, 0  ;;  %v1022_v7 = vld [vmem:[%s1721_s1 + $0x10] sm:$0xff]   ;;  %v305_v8 = vld [vmem:[%s1722_s4 + $0x8] sm:$0xff]  ;;  %29 = vst.msk [vmem:[%s1725_s6] sm:$0xff] %vm28_vm1, %v1037_v58 }
   0x3   :  { %953 = vmatpush3.bf16.xpose.msra.mxu0 %v183_v3  ;;  %992 = vmatpush3.bf16.xpose.msra.mxu1 %v183_v3  ;;  %v307_v9 = vld [vmem:[%s1722_s4 + $0x18] sm:$0xff]  ;;  %v1028_v10 = vld [vmem:[%s1723_s0] sm:$0xff]   ;;  %v309_v13 = vld [vmem:[%s1722_s4 + $0x28] sm:$0xff]  ;;  %v189_v14 = vsel %vm157_vm0, %v1022_v7, 0  ;;  %30 = vst.msk [vmem:[%s1725_s6 + $0x8] sm:$0xff] %vm28_vm1, %v1037_v58 }
   0x4   :  { %1002 = vmatprep.subr.msk.bf16.mxu0 %vm157_vm0, %v1021_v2  ;;  %1003 = vmatprep.subr.msk.bf16.mxu1 %vm157_vm0, %v1021_v2  ;;  %v1029_v11 = vld [vmem:[%s1723_s0 + $0x20] sm:$0xff]   ;;  %v1023_v15 = vld [vmem:[%s1721_s1 + $0x18] sm:$0xff]   ;;  %v310_v16 = vld [vmem:[%s1722_s4 + $0x30] sm:$0xff]  ;;  %31 = vst.msk [vmem:[%s1725_s6 + $0x10] sm:$0xff] %vm28_vm1, %v1037_v58 }
   0x5   :  { %322 = vperm.xlu0 %1018, %v304_v4   ;;  %332 = vperm.xlu1 %1019, %v306_v5   ;;  %v308_v12 = vld [vmem:[%s1722_s4 + $0x20] sm:$0xff]  ;;  %v311_v17 = vld [vmem:[%s1722_s4 + $0x38] sm:$0xff]  ;;  %v313_v19 = vld [vmem:[%s1722_s4 + $0x48] sm:$0xff]  ;;  %v192_v20 = vsel %vm157_vm0, %v1023_v15, 0  ;;  %32 = vst.msk [vmem:[%s1725_s6 + $0x18] sm:$0xff] %vm28_vm1, %v1037_v58 }
   0x6   :  { %968 = vmatprep.mubr.msk.bf16.mxu0 %vm157_vm0, %v1028_v10  ;;  %976 = vmatprep.mubr.msk.bf16.mxu1 %vm157_vm0, %v1029_v11  ;;  %v312_v18 = vld [vmem:[%s1722_s4 + $0x40] sm:$0xff]  ;;  %v314_v22 = vld [vmem:[%s1722_s4 + $0x50] sm:$0xff]  ;;  %v315_v23 = vld [vmem:[%s1722_s4 + $0x58] sm:$0xff]  ;;  %33 = vst.msk [vmem:[%s1725_s6 + $0x20] sm:$0xff] %vm28_vm1, %v1037_v58 }
   0x7   :  { %v1024_v21 = vld [vmem:[%s1721_s1 + $0x20] sm:$0xff]   ;;  %v317_v25 = vld [vmem:[%s1722_s4 + $0x68] sm:$0xff]  ;;  %v318_v28 = vld [vmem:[%s1722_s4 + $0x70] sm:$0xff]  ;;  %34 = vst.msk [vmem:[%s1725_s6 + $0x28] sm:$0xff] %vm28_vm1, %v1037_v58 }
   0x8   :  { %v316_v24 = vld [vmem:[%s1722_s4 + $0x60] sm:$0xff]  ;;  %v195_v26 = vsel %vm157_vm0, %v1024_v21, 0  ;;  %v1025_v27 = vld [vmem:[%s1721_s1 + $0x28] sm:$0xff]   ;;  %v319_v29 = vld [vmem:[%s1722_s4 + $0x78] sm:$0xff]  ;;  %35 = vst.msk [vmem:[%s1725_s6 + $0x30] sm:$0xff] %vm28_vm1, %v1037_v58 }
   0x9   :  { %327 = vperm.xlu0 %1018, %v305_v8   ;;  %337 = vperm.xlu1 %1019, %v307_v9   ;;  %v442_v30 = vld [vmem:[%s1724_s2] sm:$0xff]  ;;  %v443_v31 = vld [vmem:[%s1724_s2 + $0x8] sm:$0xff]  ;;  %v198_v32 = vsel %vm157_vm0, %v1025_v27, 0  ;;  %v1026_v33 = vld [vmem:[%s1721_s1 + $0x30] sm:$0xff]   ;;  %36 = vst.msk [vmem:[%s1725_s6 + $0x38] sm:$0xff] %vm28_vm1, %v1037_v58 }
   0xa   :  { %v444_v34 = vld [vmem:[%s1724_s2 + $0x10] sm:$0xff]  ;;  %v445_v35 = vld [vmem:[%s1724_s2 + $0x18] sm:$0xff]  ;;  %v446_v36 = vld [vmem:[%s1724_s2 + $0x20] sm:$0xff]  ;;  %v201_v38 = vsel %vm157_vm0, %v1026_v33, 0  ;;  %37 = vst.msk [vmem:[%s1725_s6 + $0x40] sm:$0xff] %vm28_vm1, %v1037_v58 }
   0xb   :  { %955 = vmatpush3.bf16.xpose.msra.mxu0 %v186_v6  ;;  %993 = vmatpush3.bf16.xpose.msra.mxu1 %v186_v6  ;;  %v447_v37 = vld [vmem:[%s1724_s2 + $0x28] sm:$0xff]  ;;  %v1027_v39 = vld [vmem:[%s1721_s1 + $0x38] sm:$0xff]   ;;  %v448_v40 = vld [vmem:[%s1724_s2 + $0x30] sm:$0xff]  ;;  %38 = vst.msk [vmem:[%s1725_s6 + $0x48] sm:$0xff] %vm28_vm1, %v1037_v58 }
   0xc   :  { %1004 = vmatprep.subr.msk.bf16.mxu0 %vm157_vm0, %v1022_v7  ;;  %1005 = vmatprep.subr.msk.bf16.mxu1 %vm157_vm0, %v1022_v7  ;;  %v449_v41 = vld [vmem:[%s1724_s2 + $0x38] sm:$0xff]  ;;  %v450_v42 = vld [vmem:[%s1724_s2 + $0x40] sm:$0xff]  ;;  %v451_v43 = vld [vmem:[%s1724_s2 + $0x48] sm:$0xff]  ;;  %v204_v44 = vsel %vm157_vm0, %v1027_v39, 0  ;;  %40 = vst.msk [vmem:[%s1725_s6 + $0x58] sm:$0xff] %vm28_vm1, %v1037_v58 }
   0xd   :  { %342 = vperm.xlu0 %1018, %v308_v12   ;;  %347 = vperm.xlu1 %1019, %v309_v13   ;;  %v452_v45 = vld [vmem:[%s1724_s2 + $0x50] sm:$0xff]  ;;  %v453_v46 = vld [vmem:[%s1724_s2 + $0x58] sm:$0xff]  ;;  %v1030_v47 = vld [vmem:[%s1723_s0 + $0x8] sm:$0xff]   ;;  %41 = vst.msk [vmem:[%s1725_s6 + $0x60] sm:$0xff] %vm28_vm1, %v1037_v58 }
   0xe   :  { %v1031_v48 = vld [vmem:[%s1723_s0 + $0x28] sm:$0xff]   ;;  %v454_v49 = vld [vmem:[%s1724_s2 + $0x60] sm:$0xff]  ;;  %v1032_v51 = vld [vmem:[%s1723_s0 + $0x10] sm:$0xff]   ;;  %42 = vst.msk [vmem:[%s1725_s6 + $0x68] sm:$0xff] %vm28_vm1, %v1037_v58 }
   0xf   :  { %v455_v50 = vld [vmem:[%s1724_s2 + $0x68] sm:$0xff]  ;;  %v1033_v52 = vld [vmem:[%s1723_s0 + $0x30] sm:$0xff]   ;;  %v457_v54 = vld [vmem:[%s1724_s2 + $0x78] sm:$0xff]  ;;  %43 = vst.msk [vmem:[%s1725_s6 + $0x70] sm:$0xff] %vm28_vm1, %v1037_v58 }
  0x10   :  { %v456_v53 = vld [vmem:[%s1724_s2 + $0x70] sm:$0xff]  ;;  %v1034_v55 = vld [vmem:[%s1723_s0 + $0x18] sm:$0xff]   ;;  %44 = vst.msk [vmem:[%s1725_s6 + $0x78] sm:$0xff] %vm28_vm1, %v1037_v58 }
  0x11   :  { %352 = vperm.xlu0 %1018, %v310_v16   ;;  %357 = vperm.xlu1 %1019, %v311_v17   ;;  %v1035_v56 = vld [vmem:[%s1723_s0 + $0x38] sm:$0xff]   ;;  %v621_v17 = vlaneseq }
  0x13   :  { %957 = vmatpush3.bf16.xpose.msra.mxu0 %v189_v14  ;;  %994 = vmatpush3.bf16.xpose.msra.mxu1 %v189_v14 }
  0x14   :  { %1006 = vmatprep.subr.msk.bf16.mxu0 %vm157_vm0, %v1023_v15  ;;  %1007 = vmatprep.subr.msk.bf16.mxu1 %vm157_vm0, %v1023_v15 }
  0x15   :  { %362 = vperm.xlu0 %1018, %v312_v18   ;;  %367 = vperm.xlu1 %1019, %v313_v19  }
  0x19   :  { %372 = vperm.xlu0 %1018, %v314_v22   ;;  %377 = vperm.xlu1 %1019, %v315_v23   ;;  %v1357_v22 = vshrl.u32 %v621_v17, 7 }
  0x1b   :  { %959 = vmatpush3.bf16.xpose.msra.mxu0 %v192_v20  ;;  %995 = vmatpush3.bf16.xpose.msra.mxu1 %v192_v20  ;;  %v1416_v58 = vadd.s32 112, %v1357_v22 }
  0x1c   :  { %1008 = vmatprep.subr.msk.bf16.mxu0 %vm157_vm0, %v1024_v21  ;;  %1009 = vmatprep.subr.msk.bf16.mxu1 %vm157_vm0, %v1024_v21 }
  0x1d   :  { %382 = vperm.xlu0 %1018, %v316_v24   ;;  %387 = vperm.xlu1 %1019, %v317_v25   ;;  %v1362_v24 = vld [vmem:[%s1726_s5] ss:$0 sm:$0xff] }
  0x21   :  { %392 = vperm.xlu0 %1018, %v318_v28   ;;  %397 = vperm.xlu1 %1019, %v319_v29  }
  0x23   :  { %961 = vmatpush3.bf16.xpose.msra.mxu0 %v195_v26  ;;  %996 = vmatpush3.bf16.xpose.msra.mxu1 %v195_v26 }
  0x24   :  { %1010 = vmatprep.subr.msk.bf16.mxu0 %vm157_vm0, %v1025_v27  ;;  %1011 = vmatprep.subr.msk.bf16.mxu1 %vm157_vm0, %v1025_v27 }
  0x25   :  { %462 = vperm.xlu0 %1018, %v442_v30   ;;  %467 = vperm.xlu1 %1019, %v443_v31  }
  0x29   :  { %472 = vperm.xlu0 %1018, %v444_v34   ;;  %477 = vperm.xlu1 %1019, %v445_v35   ;;  %v1367_v35 = vadd.s32 80, %v1357_v22 }
  0x2b   :  { %963 = vmatpush3.bf16.xpose.msra.mxu0 %v198_v32  ;;  %997 = vmatpush3.bf16.xpose.msra.mxu1 %v198_v32 }
  0x2c   :  { %1012 = vmatprep.subr.msk.bf16.mxu0 %vm157_vm0, %v1026_v33  ;;  %1013 = vmatprep.subr.msk.bf16.mxu1 %vm157_vm0, %v1026_v33 }
  0x2d   :  { %482 = vperm.xlu0 %1018, %v446_v36   ;;  %487 = vperm.xlu1 %1019, %v447_v37   ;;  %v1369_v36 = vand.u32 127, %v621_v17  ;;  %v1372_v37 = vadd.s32 16, %v1357_v22 }
  0x2f   :  { %vm669_vm2 = vcmp.ne.s32.totalorder %v1367_v35, %v1369_v36  ;;  %vm661_vm3 = vcmp.ne.s32.totalorder %v1372_v37, %v1369_v36  ;;  %vm659_vm5 = vcmp.ne.s32.totalorder %v1357_v22, %v1369_v36  ;;  %vm673_vm14 = vcmp.ne.s32.totalorder %v1416_v58, %v1369_v36 }
  0x31   :  { %492 = vperm.xlu0 %1018, %v448_v40   ;;  %497 = vperm.xlu1 %1019, %v449_v41   ;;  %v1381_v40 = vadd.s32 64, %v1357_v22  ;;  %v1384_v41 = vadd.s32 24, %v1357_v22 }
  0x33   :  { %965 = vmatpush3.bf16.xpose.msra.mxu0 %v201_v38  ;;  %998 = vmatpush3.bf16.xpose.msra.mxu1 %v201_v38  ;;  %vm667_vm4 = vcmp.ne.s32.totalorder %v1381_v40, %v1369_v36  ;;  %vm662_vm6 = vcmp.ne.s32.totalorder %v1384_v41, %v1369_v36 }
  0x34   :  { %1014 = vmatprep.subr.msk.bf16.mxu0 %vm157_vm0, %v1027_v39  ;;  %1015 = vmatprep.subr.msk.bf16.mxu1 %vm157_vm0, %v1027_v39  ;;  %v1378_v39 = vld [vmem:[%s1727_s3] ss:$0 sm:$0xff] }
  0x35   :  { %502 = vperm.xlu0 %1018, %v450_v42   ;;  %507 = vperm.xlu1 %1019, %v451_v43   ;;  %v1387_v42 = vadd.s32 8, %v1357_v22 }
  0x37   :  { %vm660_vm7 = vcmp.ne.s32.totalorder %v1387_v42, %v1369_v36 }
  0x39   :  { %512 = vperm.xlu0 %1018, %v452_v45   ;;  %517 = vperm.xlu1 %1019, %v453_v46   ;;  %v1397_v46 = vadd.s32 88, %v1357_v22 }
  0x3b   :  { %967 = vmatpush3.bf16.xpose.msra.mxu0 %v204_v44  ;;  %999 = vmatpush3.bf16.xpose.msra.mxu1 %v204_v44  ;;  %vm670_vm8 = vcmp.ne.s32.totalorder %v1397_v46, %v1369_v36 }
  0x3d   :  { %522 = vperm.xlu0 %1018, %v454_v49   ;;  %527 = vperm.xlu1 %1019, %v455_v50  }
  0x41   :  { %532 = vperm.xlu0 %1018, %v456_v53   ;;  %537 = vperm.xlu1 %1019, %v457_v54  }
  0x42   :  { %969 = vmatmul.mubr.msk.bf16.vlgmr.msra.gmra.mrb[0].mxu0 %vm157_vm0, %v1030_v47  ;;  %977 = vmatmul.mubr.msk.bf16.vlgmr.msra.gmra.mrb[0].mxu1 %vm157_vm0, %v1031_v48 }
  0x43   :  { %972 = vmatprep.mubr.msk.bf16.mxu0 %vm157_vm0, %v1032_v51  ;;  %980 = vmatprep.mubr.msk.bf16.mxu1 %vm157_vm0, %v1033_v52  ;;  %v1404_v51 = vadd.s32 48, %v1357_v22  ;;  %v1407_v52 = vadd.s32 72, %v1357_v22 }
  0x45   :  { %vm665_vm9 = vcmp.ne.s32.totalorder %v1404_v51, %v1369_v36  ;;  %vm668_vm10 = vcmp.ne.s32.totalorder %v1407_v52, %v1369_v36 }
  0x4a   :  { %973 = vmatmul.mubr.msk.bf16.gmra.mrb[4].mxu0 %vm157_vm0, %v1034_v55  ;;  %981 = vmatmul.mubr.msk.bf16.gmra.mrb[4].mxu1 %vm157_vm0, %v1035_v56 }
  0x84   :  { %v1249_v57 = vpop.permute.xlu0 %322  ;;  %v333_v59 = vpop.permute.xlu1 %332 }
  0x88   :  { %v1315_v60 = vpop.permute.xlu0 %327  ;;  %v1317_v61 = vpop.permute.xlu1 %337 }
  0x8c   :  { %v1319_v62 = vpop.permute.xlu0 %342  ;;  %v1321_v63 = vpop.permute.xlu1 %347 }
  0x90   :  { %v1323_v0 = vpop.permute.xlu0 %352  ;;  %v1325_v1 = vpop.permute.xlu1 %357 }
  0x94   :  { %v363_v2 = vpop.permute.xlu0 %362  ;;  %v1327_v3 = vpop.permute.xlu1 %367 }
  0x98   :  { %v373_v4 = vpop.permute.xlu0 %372  ;;  %v1329_v5 = vpop.permute.xlu1 %377 }
  0x9c   :  { %v1331_v6 = vpop.permute.xlu0 %382  ;;  %v1333_v7 = vpop.permute.xlu1 %387 }
  0xa0   :  { %v1335_v8 = vpop.permute.xlu0 %392  ;;  %v1337_v9 = vpop.permute.xlu1 %397 }
  0xa4   :  { %v1339_v10 = vpop.permute.xlu0 %462  ;;  %v1341_v11 = vpop.permute.xlu1 %467 }
  0xa8   :  { %v1343_v12 = vpop.permute.xlu0 %472  ;;  %v1345_v13 = vpop.permute.xlu1 %477 }
  0xac   :  { %v1347_v14 = vpop.permute.xlu0 %482  ;;  %v1349_v15 = vpop.permute.xlu1 %487 }
  0xb0   :  { %v1351_v16 = vpop.permute.xlu0 %492  ;;  %v1353_v18 = vpop.permute.xlu1 %497 }
  0xb4   :  { %v1355_v19 = vpop.permute.xlu0 %502  ;;  %v1399_v47 = vpop.permute.xlu1 %507 }
  0xb8   :  { %v513_v48 = vpop.permute.xlu0 %512 }
 0x115   :  { %v970_v20 = vpop.f32.mrb[0].mxu0  ;;  %v978_v21 = vpop.f32.mrb[0].mxu1 }
 0x116   :  { %v402_v23 = vsub.f32 %v970_v20, %v333_v59  ;;  %v410_v25 = vsub.f32 %v978_v21, %v373_v4  ;;  %v240_v26 = vpop.f32.mrb[1].mxu0  ;;  %v272_v27 = vpop.f32.mrb[1].mxu1  ;;  %v1421_v4 = vadd.s32 32, %v1357_v22 }
 0x117   :  { %v400_v28 = vsub.f32 %v240_v26, %v1249_v57  ;;  %v408_v29 = vsub.f32 %v272_v27, %v363_v2  ;;  %v971_v30 = vpop.f32.mrb[2].mxu0  ;;  %v979_v31 = vpop.f32.mrb[2].mxu1 }
 0x118   :  { %v243_v32 = vpop.f32.mrb[3].mxu0  ;;  %v275_v33 = vpop.f32.mrb[3].mxu1  ;;  %v436_v34 = vsub.f32 %v410_v25, %v1362_v24  ;;  %v428_v38 = vsub.f32 %v402_v23, %v1362_v24  ;;  %v403_v45 = vsub.f32 %v971_v30, %v1317_v61  ;;  %v411_v49 = vsub.f32 %v979_v31, %v1329_v5 }
 0x119   :  { %v1390_v43 = vsub.f32 %v400_v28, %v1362_v24  ;;  %v1393_v44 = vsub.f32 %v408_v29, %v1362_v24  ;;  %v401_v50 = vsub.f32 %v243_v32, %v1315_v60  ;;  %v409_v55 = vsub.f32 %v275_v33, %v1327_v3 }
 0x11a   :  { %v550_v53 = vsub.f32 %v436_v34, %v513_v48  ;;  %v588_v54 = vsub.f32 %v436_v34, %v1378_v39  ;;  %v542_v59 = vsub.f32 %v428_v38, %v1343_v12  ;;  %v580_v60 = vsub.f32 %v428_v38, %v1378_v39  ;;  %v518_v38 = vpop.permute.xlu1 %517 }
 0x11b   :  { %v1424_v3 = vadd.s32 96, %v1357_v22  ;;  %v540_v5 = vsub.f32 %v1390_v43, %v1339_v10  ;;  %v578_v17 = vsub.f32 %v1390_v43, %v1378_v39  ;;  %v548_v20 = vsub.f32 %v1393_v44, %v1355_v19 }
 0x11c   :  { %v429_v12 = vsub.f32 %v403_v45, %v1362_v24  ;;  %v1436_v25 = vsub.f32 %v411_v49, %v1362_v24  ;;  %v427_v26 = vsub.f32 %v401_v50, %v1362_v24  ;;  %v586_v19 = vsub.f32 %v1393_v44, %v1378_v39 }
 0x11d   :  { %v974_v56 = vpop.f32.mrb[4].mxu0  ;;  %v982_v57 = vpop.f32.mrb[4].mxu1  ;;  %v1450_v30 = vsub.f32 %v409_v55, %v1362_v24  ;;  %v566_v31 = vmax.f32 %v550_v53, 0.0  ;;  %v604_v32 = vmax.f32 %v588_v54, 0.0  ;;  %v558_v34 = vmax.f32 %v542_v59, 0.0 }
 0x11e   :  { %v256_v61 = vpop.f32.mrb[5].mxu0  ;;  %v288_v2 = vpop.f32.mrb[5].mxu1  ;;  %v406_v27 = vsub.f32 %v974_v56, %v1323_v0  ;;  %v543_v43 = vsub.f32 %v429_v12, %v1345_v13  ;;  %v596_v48 = vmax.f32 %v580_v60, 0.0  ;;  %v581_v49 = vsub.f32 %v429_v12, %v1378_v39 }
 0x11f   :  { %v975_v21 = vpop.f32.mrb[6].mxu0  ;;  %v1433_v23 = vpop.f32.mrb[6].mxu1  ;;  %v404_v10 = vsub.f32 %v256_v61, %v1319_v62  ;;  %v414_v62 = vsub.f32 %v982_v57, %v1335_v8  ;;  %v412_v0 = vsub.f32 %v288_v2, %v1331_v6  ;;  %v551_v8 = vsub.f32 %v1436_v25, %v518_v38 }
 0x120   :  { %v1441_v28 = vpop.f32.mrb[7].mxu0  ;;  %v1443_v29 = vpop.f32.mrb[7].mxu1  ;;  %v407_v33 = vsub.f32 %v975_v21, %v1325_v1  ;;  %v432_v44 = vsub.f32 %v406_v27, %v1362_v24  ;;  %v589_v1 = vsub.f32 %v1436_v25, %v1378_v39  ;;  %v541_v6 = vsub.f32 %v427_v26, %v1341_v11 }
 0x121   :  { %v1464_v45 = vsub.f32 %v404_v10, %v1362_v24  ;;  %v579_v50 = vsub.f32 %v427_v26, %v1378_v39  ;;  %v549_v13 = vsub.f32 %v1450_v30, %v1399_v47  ;;  %v587_v53 = vsub.f32 %v1450_v30, %v1378_v39 }
 0x122   :  { %v405_v54 = vsub.f32 %v1441_v28, %v1321_v63  ;;  %v1481_v55 = vsub.f32 %v414_v62, %v1362_v24  ;;  %v1484_v56 = vsub.f32 %v412_v0, %v1362_v24  ;;  %v1487_v11 = vsub.f32 %v407_v33, %v1362_v24 }
 0x123   :  { %v413_v47 = vsub.f32 %v1443_v29, %v1333_v7  ;;  %v546_v57 = vsub.f32 %v432_v44, %v1351_v16  ;;  %v584_v59 = vsub.f32 %v432_v44, %v1378_v39  ;;  %v544_v60 = vsub.f32 %v1464_v45, %v1347_v14 }
 0x124   :  { %v582_v61 = vsub.f32 %v1464_v45, %v1378_v39  ;;  %v685_v2 = vsel %vm669_vm2, %v566_v31, 0.0  ;;  %v701_v7 = vsel %vm669_vm2, %v604_v32, 0.0  ;;  %v677_v16 = vsel %vm661_vm3, %v558_v34, 0.0  ;;  %v523_v31 = vpop.permute.xlu0 %522 }
 0x125   :  { %v693_v12 = vsel %vm661_vm3, %v596_v48, 0.0  ;;  %v733_v14 = vadd.f32 %v701_v7, %v685_v2  ;;  %v564_v25 = vmax.f32 %v548_v20, 0.0  ;;  %v602_v26 = vmax.f32 %v586_v19, 0.0 }
 0x126   :  { %v725_v21 = vadd.f32 %v693_v12, %v677_v16  ;;  %v556_v27 = vmax.f32 %v540_v5, 0.0  ;;  %v594_v10 = vmax.f32 %v578_v17, 0.0  ;;  %v559_v29 = vmax.f32 %v543_v43, 0.0 }
 0x127   :  { %v597_v35 = vmax.f32 %v581_v49, 0.0  ;;  %vm663_vm11 = vcmp.ne.s32.totalorder %v1421_v4, %v1369_v36  ;;  %759 = vadd.xlane.f32.xlu1 %v733_v14  ;;  %v683_v37 = vsel %vm667_vm4, %v564_v25, 0.0  ;;  %v699_v20 = vsel %vm667_vm4, %v602_v26, 0.0 }
 0x128   :  { %743 = vadd.xlane.f32.xlu0 %v725_v21  ;;  %v557_v19 = vmax.f32 %v541_v6, 0.0  ;;  %v595_v30 = vmax.f32 %v579_v50, 0.0  ;;  %v731_v5 = vadd.f32 %v699_v20, %v683_v37  ;;  %v675_v17 = vsel %vm659_vm5, %v556_v27, 0.0  ;;  %v533_v7 = vpop.permute.xlu0 %532 }
 0x129   :  { %v691_v32 = vsel %vm659_vm5, %v594_v10, 0.0  ;;  %v678_v62 = vsel %vm662_vm6, %v559_v29, 0.0  ;;  %v694_v40 = vsel %vm662_vm6, %v597_v35, 0.0  ;;  %v552_v38 = vsub.f32 %v1484_v56, %v523_v31 }
 0x12a   :  { %v723_v0 = vadd.f32 %v691_v32, %v675_v17  ;;  %v676_v33 = vsel %vm660_vm7, %v557_v19, 0.0  ;;  %v692_v34 = vsel %vm660_vm7, %v595_v30, 0.0  ;;  %v590_v43 = vsub.f32 %v1484_v56, %v1378_v39 }
 0x12b   :  { %v567_v44 = vmax.f32 %v551_v8, 0.0  ;;  %v605_v45 = vmax.f32 %v589_v1, 0.0  ;;  %vm671_vm12 = vcmp.ne.s32.totalorder %v1424_v3, %v1369_v36  ;;  %755 = vadd.xlane.f32.xlu1 %v731_v5  ;;  %v726_v41 = vadd.f32 %v694_v40, %v678_v62 }
 0x12c   :  { %739 = vadd.xlane.f32.xlu0 %v723_v0  ;;  %v724_v48 = vadd.f32 %v692_v34, %v676_v33  ;;  %v562_v49 = vmax.f32 %v546_v57, 0.0  ;;  %v600_v6 = vmax.f32 %v584_v59, 0.0  ;;  %v565_v56 = vmax.f32 %v549_v13, 0.0 }
 0x12d   :  { %v686_v42 = vsel %vm670_vm8, %v567_v44, 0.0  ;;  %v702_v50 = vsel %vm670_vm8, %v605_v45, 0.0  ;;  %v603_v8 = vmax.f32 %v587_v53, 0.0  ;;  %v560_v57 = vmax.f32 %v544_v60, 0.0 }
 0x12e   :  { %v681_v1 = vsel %vm665_vm9, %v562_v49, 0.0  ;;  %v697_v2 = vsel %vm665_vm9, %v600_v6, 0.0  ;;  %v598_v59 = vmax.f32 %v582_v61, 0.0  ;;  %v547_v16 = vsub.f32 %v1487_v11, %v1353_v18 }
 0x12f   :  { %v585_v46 = vsub.f32 %v1487_v11, %v1378_v39  ;;  %v415_v13 = vsub.f32 %v1433_v23, %v1337_v9  ;;  %v431_v53 = vsub.f32 %v405_v54, %v1362_v24  ;;  %v554_v51 = vsub.f32 %v1481_v55, %v533_v7  ;;  %741 = vadd.xlane.f32.xlu1 %v724_v48  ;;  %v528_v23 = vpop.permute.xlu1 %527 }
 0x130   :  { %v592_v60 = vsub.f32 %v1481_v55, %v1378_v39  ;;  %v439_v61 = vsub.f32 %v413_v47, %v1362_v24  ;;  %745 = vadd.xlane.f32.xlu0 %v726_v41  ;;  %v629_v18 = vadd.s32 56, %v1357_v22  ;;  %v734_v11 = vadd.f32 %v702_v50, %v686_v42 }
 0x131   :  { %v729_v12 = vadd.f32 %v697_v2, %v681_v1  ;;  %v684_v9 = vsel %vm668_vm10, %v565_v56, 0.0  ;;  %v700_v63 = vsel %vm668_vm10, %v603_v8, 0.0  ;;  %v679_v28 = vsel %vm663_vm11, %v560_v57, 0.0  ;;  %v709_v2 = vld [vmem:[%s1725_s6 + $0x10] sm:$0xff] }
 0x132   :  { %v695_v54 = vsel %vm663_vm11, %v598_v59, 0.0  ;;  %v568_v55 = vmax.f32 %v552_v38, 0.0  ;;  %v606_v47 = vmax.f32 %v590_v43, 0.0  ;;  %v545_v14 = vsub.f32 %v431_v53, %v1349_v15 }
 0x133   :  { %v583_v21 = vsub.f32 %v431_v53, %v1378_v39  ;;  %v563_v25 = vmax.f32 %v547_v16, 0.0  ;;  %v601_v26 = vmax.f32 %v585_v46, 0.0  ;;  %v441_v52 = vsub.f32 %v415_v13, %v1362_v24  ;;  %751 = vadd.xlane.f32.xlu1 %v729_v12  ;;  %v538_v17 = vpop.permute.xlu1 %537  ;;  %v707_v46 = vld [vmem:[%s1725_s6] sm:$0xff] }
 0x134   :  { %761 = vadd.xlane.f32.xlu0 %v734_v11  ;;  %vm666_vm13 = vcmp.ne.s32.totalorder %v629_v18, %v1369_v36  ;;  %v627_v4 = vadd.s32 40, %v1357_v22  ;;  %v553_v27 = vsub.f32 %v439_v61, %v528_v23  ;;  %v591_v10 = vsub.f32 %v439_v61, %v1378_v39  ;;  %v710_v61 = vld [vmem:[%s1725_s6 + $0x18] sm:$0xff]  ;;  %v708_v18 = vld [vmem:[%s1725_s6 + $0x8] sm:$0xff] }
 0x135   :  { %v732_v29 = vadd.f32 %v700_v63, %v684_v9  ;;  %v727_v15 = vadd.f32 %v695_v54, %v679_v28  ;;  %v687_v35 = vsel %vm671_vm12, %v568_v55, 0.0  ;;  %v703_v24 = vsel %vm671_vm12, %v606_v47, 0.0  ;;  %v718_v23 = vld [vmem:[%s1725_s6 + $0x58] sm:$0xff]  ;;  %v713_v28 = vld [vmem:[%s1725_s6 + $0x30] sm:$0xff] }
 0x136   :  { %v570_v37 = vmax.f32 %v554_v51, 0.0  ;;  %v608_v20 = vmax.f32 %v592_v60, 0.0  ;;  %v682_v19 = vsel %vm666_vm13, %v563_v25, 0.0  ;;  %v698_v30 = vsel %vm666_vm13, %v601_v26, 0.0  ;;  %v711_v25 = vld [vmem:[%s1725_s6 + $0x20] sm:$0xff] }
 0x137   :  { %v561_v31 = vmax.f32 %v545_v14, 0.0  ;;  %v599_v5 = vmax.f32 %v583_v21, 0.0  ;;  %747 = vadd.xlane.f32.xlu1 %v727_v15  ;;  %vm664_vm15 = vcmp.ne.s32.totalorder %v627_v4, %v1369_v36  ;;  %v635_v32 = vadd.s32 104, %v1357_v22  ;;  %v716_v21 = vld [vmem:[%s1725_s6 + $0x48] sm:$0xff] }
 0x138   :  { %757 = vadd.xlane.f32.xlu0 %v732_v29  ;;  %v555_v62 = vsub.f32 %v441_v52, %v538_v17  ;;  %v593_v0 = vsub.f32 %v441_v52, %v1378_v39  ;;  %v735_v40 = vadd.f32 %v703_v24, %v687_v35  ;;  %v730_v33 = vadd.f32 %v698_v30, %v682_v19  ;;  %v714_v29 = vld [vmem:[%s1725_s6 + $0x38] sm:$0xff]  ;;  %v712_v19 = vld [vmem:[%s1725_s6 + $0x28] sm:$0xff] }
 0x139   :  { %v689_v3 = vsel %vm673_vm14, %v570_v37, 0.0  ;;  %v705_v34 = vsel %vm673_vm14, %v608_v20, 0.0  ;;  %v680_v38 = vsel %vm664_vm15, %v561_v31, 0.0  ;;  %v696_v43 = vsel %vm664_vm15, %v599_v5, 0.0  ;;  %v721_v20 = vld [vmem:[%s1725_s6 + $0x70] sm:$0xff] }
 0x13a   :  { %v569_v44 = vmax.f32 %v553_v27, 0.0  ;;  %v607_v45 = vmax.f32 %v591_v10, 0.0  ;;  %vm672_vm0 = vcmp.ne.s32.totalorder %v635_v32, %v1369_v36  ;;  %v637_v39 = vadd.s32 120, %v1357_v22  ;;  %v717_v22 = vld [vmem:[%s1725_s6 + $0x50] sm:$0xff]  ;;  %v719_v10 = vld [vmem:[%s1725_s6 + $0x60] sm:$0xff]  ;;  %v720_v32 = vld [vmem:[%s1725_s6 + $0x68] sm:$0xff] }
 0x13b   :  { %763 = vadd.xlane.f32.xlu1 %v735_v40  ;;  %v737_v41 = vadd.f32 %v705_v34, %v689_v3  ;;  %v728_v48 = vadd.f32 %v696_v43, %v680_v38  ;;  %v571_v42 = vmax.f32 %v555_v62, 0.0  ;;  %v609_v50 = vmax.f32 %v593_v0, 0.0  ;;  %v722_v40 = vld [vmem:[%s1725_s6 + $0x78] sm:$0xff] }
 0x13c   :  { %753 = vadd.xlane.f32.xlu0 %v730_v33  ;;  %v688_v49 = vsel %vm672_vm0, %v569_v44, 0.0  ;;  %v704_v6 = vsel %vm672_vm0, %v607_v45, 0.0  ;;  %vm674_vm2 = vcmp.ne.s32.totalorder %v637_v39, %v1369_v36  ;;  %v715_v36 = vld [vmem:[%s1725_s6 + $0x40] sm:$0xff] }
 0x13d   :  { %v736_v58 = vadd.f32 %v704_v6, %v688_v49  ;;  %v690_v56 = vsel %vm674_vm2, %v571_v42, 0.0  ;;  %v706_v8 = vsel %vm674_vm2, %v609_v50, 0.0 }
 0x13e   :  { %v738_v1 = vadd.f32 %v706_v8, %v690_v56 }
 0x13f   :  { %767 = vadd.xlane.f32.xlu1 %v737_v41 }
 0x140   :  { %749 = vadd.xlane.f32.xlu0 %v728_v48 }
 0x144   :  { %765 = vadd.xlane.f32.xlu0 %v736_v58 }
 0x148   :  { %769 = vadd.xlane.f32.xlu0 %v738_v1 }
 0x1b4   :  { %v760_v57 = vpop.xlane.xlu1 %759 }
 0x1b5   :  { %v744_v59 = vpop.xlane.xlu0 %743  ;;  %v781_v7 = vadd.f32 %v760_v57, %v717_v22 }
 0x1b6   :  { %v773_v16 = vadd.f32 %v744_v59, %v709_v2 }
 0x1b7   :  { %798 = vst.msk [vmem:[%s1725_s6 + $0x50] sm:$0xff] %vm28_vm1, %v781_v7 }
 0x1b8   :  { %790 = vst.msk [vmem:[%s1725_s6 + $0x10] sm:$0xff] %vm28_vm1, %v773_v16  ;;  %v756_v13 = vpop.xlane.xlu1 %755 }
 0x1b9   :  { %v740_v53 = vpop.xlane.xlu0 %739  ;;  %v779_v51 = vadd.f32 %v756_v13, %v715_v36 }
 0x1ba   :  { %v771_v60 = vadd.f32 %v740_v53, %v707_v46 }
 0x1bb   :  { %796 = vst.msk [vmem:[%s1725_s6 + $0x40] sm:$0xff] %vm28_vm1, %v779_v51 }
 0x1bc   :  { %788 = vst.msk [vmem:[%s1725_s6] sm:$0xff] %vm28_vm1, %v771_v60  ;;  %v742_v12 = vpop.xlane.xlu1 %741 }
 0x1bd   :  { %v746_v11 = vpop.xlane.xlu0 %745  ;;  %v772_v63 = vadd.f32 %v742_v12, %v708_v18 }
 0x1be   :  { %v774_v9 = vadd.f32 %v746_v11, %v710_v61 }
 0x1bf   :  { %789 = vst.msk [vmem:[%s1725_s6 + $0x8] sm:$0xff] %vm28_vm1, %v772_v63 }
 0x1c0   :  { %791 = vst.msk [vmem:[%s1725_s6 + $0x18] sm:$0xff] %vm28_vm1, %v774_v9  ;;  %v752_v55 = vpop.xlane.xlu1 %751 }
 0x1c1   :  { %v762_v54 = vpop.xlane.xlu0 %761  ;;  %v777_v14 = vadd.f32 %v752_v55, %v713_v28 }
 0x1c2   :  { %v782_v47 = vadd.f32 %v762_v54, %v718_v23 }
 0x1c3   :  { %794 = vst.msk [vmem:[%s1725_s6 + $0x30] sm:$0xff] %vm28_vm1, %v777_v14 }
 0x1c4   :  { %799 = vst.msk [vmem:[%s1725_s6 + $0x58] sm:$0xff] %vm28_vm1, %v782_v47  ;;  %v748_v52 = vpop.xlane.xlu1 %747 }
 0x1c5   :  { %v758_v26 = vpop.xlane.xlu0 %757  ;;  %v775_v27 = vadd.f32 %v748_v52, %v711_v25 }
 0x1c6   :  { %v780_v4 = vadd.f32 %v758_v26, %v716_v21 }
 0x1c7   :  { %792 = vst.msk [vmem:[%s1725_s6 + $0x20] sm:$0xff] %vm28_vm1, %v775_v27 }
 0x1c8   :  { %797 = vst.msk [vmem:[%s1725_s6 + $0x48] sm:$0xff] %vm28_vm1, %v780_v4  ;;  %v764_v15 = vpop.xlane.xlu1 %763 }
 0x1c9   :  { %v754_v35 = vpop.xlane.xlu0 %753  ;;  %v783_v24 = vadd.f32 %v764_v15, %v719_v10 }
 0x1ca   :  { %v778_v37 = vadd.f32 %v754_v35, %v714_v29 }
 0x1cb   :  { %800 = vst.msk [vmem:[%s1725_s6 + $0x60] sm:$0xff] %vm28_vm1, %v783_v24 }
 0x1cc   :  { %795 = vst.msk [vmem:[%s1725_s6 + $0x38] sm:$0xff] %vm28_vm1, %v778_v37  ;;  %v768_v30 = vpop.xlane.xlu1 %767 }
 0x1cd   :  { %v750_v31 = vpop.xlane.xlu0 %749  ;;  %v785_v5 = vadd.f32 %v768_v30, %v721_v20 }
 0x1ce   :  { %v776_v17 = vadd.f32 %v750_v31, %v712_v19 }
 0x1cf   :  { %802 = vst.msk [vmem:[%s1725_s6 + $0x70] sm:$0xff] %vm28_vm1, %v785_v5 }
 0x1d0   :  { %793 = vst.msk [vmem:[%s1725_s6 + $0x28] sm:$0xff] %vm28_vm1, %v776_v17 }
 0x1d1   :  { %v766_v62 = vpop.xlane.xlu0 %765 }
 0x1d2   :  { %v784_v0 = vadd.f32 %v766_v62, %v720_v32 }
 0x1d4   :  { %801 = vst.msk [vmem:[%s1725_s6 + $0x68] sm:$0xff] %vm28_vm1, %v784_v0 }
 0x1d5   :  { %v770_v33 = vpop.xlane.xlu0 %769 }
 0x1d6   :  { %v786_v3 = vadd.f32 %v770_v33, %v722_v40 }
 0x1d8   :  { %803 = vst.msk [vmem:[%s1725_s6 + $0x78] sm:$0xff] %vm28_vm1, %v786_v3 }

</bundles_post_ra>
